<compile_context>
chip_gen: v5e
topology: v5e:2x2
jax: 0.10.0
libtpu: 0.0.40
codegen_flags: <defaults>
</compile_context>

<pallas_src>
import functools
import math

import jax
import jax.numpy as jnp
from jax.experimental import pallas as pl
from jax.experimental.pallas import tpu as pltpu


def _disc_mlp_kernel(feat_ref, lab_ref, cls_ref, w1_ref, w2_ref, b2_ref,
                     w3_ref, b3_ref, o_ref, *, num_classes):
    """sigmoid(leaky_relu(leaky_relu(feat@W1f + cls_rows[label]) @ W2 + b2) . w3 + b3)."""
    # fc1 feature half: f32 tile cast to bf16 on the VPU, single MXU matmul,
    # f32 accumulation.
    feat = feat_ref[...].astype(jnp.bfloat16)                 # (tb, F)
    h1 = jnp.dot(feat, w1_ref[...], preferred_element_type=jnp.float32)  # (tb, H1)

    # fc1 embedding half + bias: select the precomputed per-class row
    # (emb_tbl[c] @ W1[F:] + b1) with an unrolled select chain (num_classes is
    # small and static) instead of a K=num_classes matmul.
    lab = lab_ref[...]                                        # (tb, 1) int32
    cls = cls_ref[...]                                        # (num_classes, H1) f32
    contrib = jnp.broadcast_to(cls[0:1, :], h1.shape)
    for c in range(1, num_classes):
        contrib = jnp.where(lab == c, cls[c:c + 1, :], contrib)
    h1 = h1 + contrib
    h1 = jnp.maximum(h1, 0.2 * h1)                            # F.leaky_relu(., 0.2)

    # fc2: bf16 MXU matmul, f32 accumulate, f32 epilogue.
    h2 = jnp.dot(h1.astype(jnp.bfloat16), w2_ref[...],
                 preferred_element_type=jnp.float32)          # (tb, H2)
    h2 = h2 + b2_ref[...]
    h2 = jnp.maximum(h2, 0.2 * h2)                            # F.leaky_relu(., 0.2)

    # fc3: (tb,128)@(128,1) replaced by VPU mul + cross-lane reduce (XLU).
    logit = jnp.sum(h2 * w3_ref[...], axis=-1, keepdims=True) + b3_ref[...]  # (tb, 1)
    prob = jax.nn.sigmoid(logit)                              # torch.sigmoid

    # Lane-dense store: (tb, 1) -> (1, 1, tb) row (row-major order preserved).
    o_ref[...] = prob.reshape(o_ref.shape).astype(o_ref.dtype)


def _pick_batch_tile(batch, requested):
    if requested is not None:
        assert batch % requested == 0, "batch must be divisible by batch_tile"
        return requested
    # Multiples of 16 (bf16 packs 16 rows per vreg); per-step VMEM stays tiny
    # even at 4096 rows, and bigger tiles amortize the ~0.35us per-step cost.
    # On v7x (2 TCs) prefer a batch_tile giving >= 2 grid steps; on v5e/v6e a
    # single full-batch step is usually best for small batches.
    for cand in (4096, 2048, 1024, 512, 256, 128, 64, 32, 16, 8):
        if batch % cand == 0:
            return cand
    return batch  # small / ragged batch: single full-batch tile


def discriminator_forward(features, labels, params, *, batch_tile=None):
    """features: (B, feature_dim) f32, labels: (B,) int32 -> (B, 1) f32."""
    emb_tbl = params["label_emb"]      # (num_classes, num_classes)
    w1, b1 = params["w1"], params["b1"]
    w2, b2 = params["w2"], params["b2"]
    w3, b3 = params["w3"], params["b3"]

    B, F = features.shape
    C = emb_tbl.shape[1]
    H1 = w1.shape[1]
    H2 = w2.shape[1]

    # Precompute per-class fc1 contributions in f32 (tiny, param-only):
    #   class_rows[c] = emb_tbl[c] @ W1[F:] + b1   -> (num_classes, H1)
    class_rows = (emb_tbl.astype(jnp.float32) @ w1[F:, :].astype(jnp.float32)
                  + b1.astype(jnp.float32))

    # Resident weights: bf16 for MXU operands, f32 for the VPU/EUP epilogue.
    w1f = w1[:F, :].astype(jnp.bfloat16)                      # feature half of fc1
    w2_bf = w2.astype(jnp.bfloat16)
    b2_f = b2.astype(jnp.float32)                             # (1, H2)
    w3_row = w3.reshape(1, H2).astype(jnp.float32)            # (1, H2) for VPU reduce
    b3_f = b3.astype(jnp.float32)                             # (1, 1)

    labels2d = labels.astype(jnp.int32).reshape(B, 1)

    tb = _pick_batch_tile(B, batch_tile)
    n_tiles = B // tb
    grid = (n_tiles,)

    out = pl.pallas_call(
        functools.partial(_disc_mlp_kernel, num_classes=C),
        # Lane-dense output: one (1, tb) row per grid step.
        out_shape=jax.ShapeDtypeStruct((n_tiles, 1, tb), jnp.float32),
        grid_spec=pltpu.PrefetchScalarGridSpec(
            num_scalar_prefetch=0,
            grid=grid,
            in_specs=[
                pl.BlockSpec((tb, F), lambda i: (i, 0)),      # features (streamed f32)
                pl.BlockSpec((tb, 1), lambda i: (i, 0)),      # labels (int32)
                pl.BlockSpec((C, H1), lambda i: (0, 0)),      # per-class fc1 rows, resident
                pl.BlockSpec((F, H1), lambda i: (0, 0)),      # W1 (feature rows), resident
                pl.BlockSpec((H1, H2), lambda i: (0, 0)),     # W2, resident
                pl.BlockSpec((1, H2), lambda i: (0, 0)),      # b2
                pl.BlockSpec((1, H2), lambda i: (0, 0)),      # w3 as a row
                pl.BlockSpec((1, 1), lambda i: (0, 0)),       # b3
            ],
            out_specs=pl.BlockSpec((1, 1, tb), lambda i: (i, 0, 0)),
        ),
        compiler_params=pltpu.CompilerParams(
            dimension_semantics=("parallel",),                # batch tiles -> both TCs on v7x
        ),
    )(features.astype(jnp.float32), labels2d, class_rows,
      w1f, w2_bf, b2_f, w3_row, b3_f)

    # (n_tiles, 1, tb) row-major == batch order -> (B, 1).
    return out.reshape(B, 1)


def init_params(key, feature_dim, num_classes):
    """Deterministic init mirroring the PyTorch module's shapes.

    nn.Embedding(num_classes, num_classes): N(0,1)
    nn.Linear(in, out): U(-1/sqrt(in), 1/sqrt(in)) for weight & bias.
    Weights stored transposed as (in, out) for x @ W.
    """
    d_in = feature_dim + num_classes
    ks = jax.random.split(key, 7)

    def linear(kw, kb, fan_in, fan_out):
        bound = 1.0 / math.sqrt(fan_in)
        w = jax.random.uniform(kw, (fan_in, fan_out), jnp.float32, -bound, bound)
        b = jax.random.uniform(kb, (1, fan_out), jnp.float32, -bound, bound)
        return w, b

    emb = jax.random.normal(ks[0], (num_classes, num_classes), jnp.float32)
    w1, b1 = linear(ks[1], ks[2], d_in, 256)
    w2, b2 = linear(ks[3], ks[4], 256, 128)
    w3, b3 = linear(ks[5], ks[6], 128, 1)
    return {"label_emb": emb, "w1": w1, "b1": b1,
            "w2": w2, "b2": b2, "w3": w3, "b3": b3}


def _reference_forward(features, labels, params):
    """Pure-JAX f32 reference (matches the PyTorch forward)."""
    x = jnp.concatenate(
        [features, jnp.take(params["label_emb"], labels, axis=0)], axis=-1)
    h1 = x @ params["w1"] + params["b1"]
    h1 = jnp.where(h1 >= 0, h1, 0.2 * h1)
    h2 = h1 @ params["w2"] + params["b2"]
    h2 = jnp.where(h2 >= 0, h2, 0.2 * h2)
    h3 = h2 @ params["w3"] + params["b3"]
    return jax.nn.sigmoid(h3)


if __name__ == "__main__":
    key = jax.random.PRNGKey(0)
    k_param, k_feat, k_lab = jax.random.split(key, 3)

    batch = 32
    feature_dim = 32
    num_classes = 4

    params = init_params(k_param, feature_dim, num_classes)
    features = jax.random.normal(k_feat, (batch, feature_dim), jnp.float32)
    labels = jax.random.randint(k_lab, (batch,), 0, num_classes, jnp.int32)

    # batch_tile=16 -> grid of 2 steps, exercising the pipelined / parallel path
    # and the lane-dense tiled output reassembly.
    out = discriminator_forward(features, labels, params, batch_tile=16)
    out = jax.block_until_ready(out)

    ref = _reference_forward(features, labels, params)
    assert out.shape == (batch, 1), out.shape
    # bf16 MXU operands with f32 accumulation -> loosened tolerance vs f32 reference.
    assert jnp.allclose(out, ref, atol=2e-2, rtol=2e-2), "mismatch vs reference"

    print("KERNEL_OK")
</pallas_src>

<mosaic_0001>
module attributes {stable_mosaic.version = 11 : i64} {
  func.func @_disc_mlp_kernel(%arg0: i32, %arg1: memref<16x32xf32, #tpu.memory_space<vmem>>, %arg2: memref<16x1xi32, #tpu.memory_space<vmem>>, %arg3: memref<4x256xf32, #tpu.memory_space<vmem>>, %arg4: memref<32x256xbf16, #tpu.memory_space<vmem>>, %arg5: memref<256x128xbf16, #tpu.memory_space<vmem>>, %arg6: memref<1x128xf32, #tpu.memory_space<vmem>>, %arg7: memref<1x128xf32, #tpu.memory_space<vmem>>, %arg8: memref<1x1xf32, #tpu.memory_space<vmem>>, %arg9: memref<1x1x16xf32, #tpu.memory_space<vmem>>) attributes {dimension_semantics = [#tpu.dimension_semantics<parallel>], iteration_bounds = array<i64: 2>, scalar_prefetch = 0 : i64, scratch_operands = 0 : i64, tpu.core_type = #tpu.core_type<tc>, window_params = [{transform_indices = @transform_0, window_bounds = array<i64: 16, 32>}, {transform_indices = @transform_1, window_bounds = array<i64: 16, 1>}, {pipeline_mode = #tpu.pipeline_mode<synchronous>, transform_indices = @transform_2, window_bounds = array<i64: 4, 256>}, {pipeline_mode = #tpu.pipeline_mode<synchronous>, transform_indices = @transform_3, window_bounds = array<i64: 32, 256>}, {pipeline_mode = #tpu.pipeline_mode<synchronous>, transform_indices = @transform_4, window_bounds = array<i64: 256, 128>}, {pipeline_mode = #tpu.pipeline_mode<synchronous>, transform_indices = @transform_5, window_bounds = array<i64: 1, 128>}, {pipeline_mode = #tpu.pipeline_mode<synchronous>, transform_indices = @transform_6, window_bounds = array<i64: 1, 128>}, {pipeline_mode = #tpu.pipeline_mode<synchronous>, transform_indices = @transform_7, window_bounds = array<i64: 1, 1>}, {transform_indices = @transform_8, window_bounds = array<i64: 1, 1, 16>}]} {
    %c0 = arith.constant 0 : index
    %c0_0 = arith.constant 0 : index
    %0 = vector.load %arg1[%c0, %c0_0] : memref<16x32xf32, #tpu.memory_space<vmem>>, vector<16x32xf32>
    %1 = arith.truncf %0 : vector<16x32xf32> to vector<16x32xbf16>
    %c0_1 = arith.constant 0 : index
    %c0_2 = arith.constant 0 : index
    %2 = vector.load %arg4[%c0_1, %c0_2] : memref<32x256xbf16, #tpu.memory_space<vmem>>, vector<32x256xbf16>
    %cst = arith.constant dense<0.000000e+00> : vector<16x256xf32>
    %3 = tpu.matmul %1, %2, %cst {dimension_numbers = #tpu.dot_dimension_numbers<[1], [0], [0], [1], [0, 0, 1, 1], [], []>} : vector<16x32xbf16>, vector<32x256xbf16>, vector<16x256xf32> -> vector<16x256xf32>
    %c0_3 = arith.constant 0 : index
    %c0_4 = arith.constant 0 : index
    %4 = vector.load %arg2[%c0_3, %c0_4] : memref<16x1xi32, #tpu.memory_space<vmem>>, vector<16x1xi32>
    %c0_5 = arith.constant 0 : index
    %c0_6 = arith.constant 0 : index
    %5 = vector.load %arg3[%c0_5, %c0_6] : memref<4x256xf32, #tpu.memory_space<vmem>>, vector<4x256xf32>
    %6 = vector.extract_strided_slice %5 {offsets = [0, 0], sizes = [1, 256], strides = [1, 1]} : vector<4x256xf32> to vector<1x256xf32>
    %7 = vector.shape_cast %6 : vector<1x256xf32> to vector<1x256xf32>
    %8 = vector.broadcast %7 : vector<1x256xf32> to vector<16x256xf32>
    %c1_i32 = arith.constant 1 : i32
    %9 = vector.broadcast %c1_i32 : i32 to vector<16x1xi32>
    %10 = arith.cmpi eq, %4, %9 : vector<16x1xi32>
    %11 = vector.extract_strided_slice %5 {offsets = [1, 0], sizes = [1, 256], strides = [1, 1]} : vector<4x256xf32> to vector<1x256xf32>
    %12 = vector.shape_cast %10 : vector<16x1xi1> to vector<16x1xi1>
    %13 = vector.broadcast %12 : vector<16x1xi1> to vector<16x256xi1>
    %14 = vector.shape_cast %11 : vector<1x256xf32> to vector<1x256xf32>
    %15 = vector.broadcast %14 : vector<1x256xf32> to vector<16x256xf32>
    %16 = arith.select %13, %15, %8 : vector<16x256xi1>, vector<16x256xf32>
    %c2_i32 = arith.constant 2 : i32
    %17 = vector.broadcast %c2_i32 : i32 to vector<16x1xi32>
    %18 = arith.cmpi eq, %4, %17 : vector<16x1xi32>
    %19 = vector.extract_strided_slice %5 {offsets = [2, 0], sizes = [1, 256], strides = [1, 1]} : vector<4x256xf32> to vector<1x256xf32>
    %20 = vector.shape_cast %18 : vector<16x1xi1> to vector<16x1xi1>
    %21 = vector.broadcast %20 : vector<16x1xi1> to vector<16x256xi1>
    %22 = vector.shape_cast %19 : vector<1x256xf32> to vector<1x256xf32>
    %23 = vector.broadcast %22 : vector<1x256xf32> to vector<16x256xf32>
    %24 = arith.select %21, %23, %16 : vector<16x256xi1>, vector<16x256xf32>
    %c3_i32 = arith.constant 3 : i32
    %25 = vector.broadcast %c3_i32 : i32 to vector<16x1xi32>
    %26 = arith.cmpi eq, %4, %25 : vector<16x1xi32>
    %27 = vector.extract_strided_slice %5 {offsets = [3, 0], sizes = [1, 256], strides = [1, 1]} : vector<4x256xf32> to vector<1x256xf32>
    %28 = vector.shape_cast %26 : vector<16x1xi1> to vector<16x1xi1>
    %29 = vector.broadcast %28 : vector<16x1xi1> to vector<16x256xi1>
    %30 = vector.shape_cast %27 : vector<1x256xf32> to vector<1x256xf32>
    %31 = vector.broadcast %30 : vector<1x256xf32> to vector<16x256xf32>
    %32 = arith.select %29, %31, %24 : vector<16x256xi1>, vector<16x256xf32>
    %33 = arith.addf %3, %32 : vector<16x256xf32>
    %cst_7 = arith.constant 2.000000e-01 : f32
    %34 = vector.broadcast %cst_7 : f32 to vector<16x256xf32>
    %35 = arith.mulf %34, %33 : vector<16x256xf32>
    %36 = arith.maximumf %33, %35 : vector<16x256xf32>
    %37 = arith.truncf %36 : vector<16x256xf32> to vector<16x256xbf16>
    %c0_8 = arith.constant 0 : index
    %c0_9 = arith.constant 0 : index
    %38 = vector.load %arg5[%c0_8, %c0_9] : memref<256x128xbf16, #tpu.memory_space<vmem>>, vector<256x128xbf16>
    %cst_10 = arith.constant dense<0.000000e+00> : vector<16x128xf32>
    %39 = tpu.matmul %37, %38, %cst_10 {dimension_numbers = #tpu.dot_dimension_numbers<[1], [0], [0], [1], [0, 0, 1, 1], [], []>} : vector<16x256xbf16>, vector<256x128xbf16>, vector<16x128xf32> -> vector<16x128xf32>
    %c0_11 = arith.constant 0 : index
    %c0_12 = arith.constant 0 : index
    %40 = vector.load %arg6[%c0_11, %c0_12] : memref<1x128xf32, #tpu.memory_space<vmem>>, vector<1x128xf32>
    %41 = vector.broadcast %40 : vector<1x128xf32> to vector<16x128xf32>
    %42 = arith.addf %39, %41 : vector<16x128xf32>
    %cst_13 = arith.constant 2.000000e-01 : f32
    %43 = vector.broadcast %cst_13 : f32 to vector<16x128xf32>
    %44 = arith.mulf %43, %42 : vector<16x128xf32>
    %45 = arith.maximumf %42, %44 : vector<16x128xf32>
    %c0_14 = arith.constant 0 : index
    %c0_15 = arith.constant 0 : index
    %46 = vector.load %arg7[%c0_14, %c0_15] : memref<1x128xf32, #tpu.memory_space<vmem>>, vector<1x128xf32>
    %47 = vector.broadcast %46 : vector<1x128xf32> to vector<16x128xf32>
    %48 = arith.mulf %45, %47 : vector<16x128xf32>
    %cst_16 = arith.constant dense<0.000000e+00> : vector<16xf32>
    %49 = vector.multi_reduction <add>, %48, %cst_16 [1] : vector<16x128xf32> to vector<16xf32>
    %50 = vector.shape_cast %49 : vector<16xf32> to vector<16x1xf32>
    %c0_17 = arith.constant 0 : index
    %c0_18 = arith.constant 0 : index
    %51 = vector.load %arg8[%c0_17, %c0_18] : memref<1x1xf32, #tpu.memory_space<vmem>>, vector<1x1xf32>
    %52 = vector.broadcast %51 : vector<1x1xf32> to vector<16x1xf32>
    %53 = arith.addf %50, %52 : vector<16x1xf32>
    %54 = arith.negf %53 : vector<16x1xf32>
    %55 = math.exp %54 : vector<16x1xf32>
    %cst_19 = arith.constant 1.000000e+00 : f32
    %56 = vector.broadcast %cst_19 : f32 to vector<16x1xf32>
    %57 = arith.addf %56, %55 : vector<16x1xf32>
    %58 = arith.divf %56, %57 : vector<16x1xf32>
    %59 = vector.shape_cast %58 : vector<16x1xf32> to vector<1x1x16xf32>
    %c0_20 = arith.constant 0 : index
    %c0_21 = arith.constant 0 : index
    %c0_22 = arith.constant 0 : index
    %60 = vector.load %arg9[%c0_20, %c0_21, %c0_22] : memref<1x1x16xf32, #tpu.memory_space<vmem>>, vector<1x1x16xf32>
    tpu.vector_store %arg9[%c0_20, %c0_21, %c0_22], %59 {strides = array<i32>} : memref<1x1x16xf32, #tpu.memory_space<vmem>>, vector<1x1x16xf32>,
    return
  }
  func.func @transform_0(%arg0: i32) -> (i32, i32) {
    %c0_i32 = arith.constant 0 : i32
    %c0_i32_0 = arith.constant 0 : i32
    return %arg0, %c0_i32 : i32, i32
  }
  func.func @transform_1(%arg0: i32) -> (i32, i32) {
    %c0_i32 = arith.constant 0 : i32
    %c0_i32_0 = arith.constant 0 : i32
    return %arg0, %c0_i32 : i32, i32
  }
  func.func @transform_2(%arg0: i32) -> (i32, i32) {
    %c0_i32 = arith.constant 0 : i32
    %c0_i32_0 = arith.constant 0 : i32
    %c0_i32_1 = arith.constant 0 : i32
    return %c0_i32, %c0_i32_0 : i32, i32
  }
  func.func @transform_3(%arg0: i32) -> (i32, i32) {
    %c0_i32 = arith.constant 0 : i32
    %c0_i32_0 = arith.constant 0 : i32
    %c0_i32_1 = arith.constant 0 : i32
    return %c0_i32, %c0_i32_0 : i32, i32
  }
  func.func @transform_4(%arg0: i32) -> (i32, i32) {
    %c0_i32 = arith.constant 0 : i32
    %c0_i32_0 = arith.constant 0 : i32
    %c0_i32_1 = arith.constant 0 : i32
    return %c0_i32, %c0_i32_0 : i32, i32
  }
  func.func @transform_5(%arg0: i32) -> (i32, i32) {
    %c0_i32 = arith.constant 0 : i32
    %c0_i32_0 = arith.constant 0 : i32
    %c0_i32_1 = arith.constant 0 : i32
    return %c0_i32, %c0_i32_0 : i32, i32
  }
  func.func @transform_6(%arg0: i32) -> (i32, i32) {
    %c0_i32 = arith.constant 0 : i32
    %c0_i32_0 = arith.constant 0 : i32
    %c0_i32_1 = arith.constant 0 : i32
    return %c0_i32, %c0_i32_0 : i32, i32
  }
  func.func @transform_7(%arg0: i32) -> (i32, i32) {
    %c0_i32 = arith.constant 0 : i32
    %c0_i32_0 = arith.constant 0 : i32
    %c0_i32_1 = arith.constant 0 : i32
    return %c0_i32, %c0_i32_0 : i32, i32
  }
  func.func @transform_8(%arg0: i32) -> (i32, i32, i32) {
    %c0_i32 = arith.constant 0 : i32
    %c0_i32_0 = arith.constant 0 : i32
    %c0_i32_1 = arith.constant 0 : i32
    return %arg0, %c0_i32, %c0_i32_0 : i32, i32, i32
  }
}

</mosaic_0001>

<bundles_post_ra>
// kernel: tpu_custom_call.1
= control target key start
LH: loop header
LB: loop body
LE: loop exit
PB: predicated region body
PF: predicated region fallthrough
CT: control target
= control target key end

     0   :  { %s1428_s0 = inlined_call_operand.vmem [shape: f32[32,32], index: 0, kind: input, shape index: {}]   ;;  %s1429_s1 = inlined_call_operand.vmem [shape: s32[32,1], index: 1, kind: input, shape index: {}]   ;;  %s1430_s2 = inlined_call_operand.hbm [shape: f32[4,256], index: 2, kind: input, shape index: {}]   ;;  %s1431_s3 = inlined_call_operand.hbm [shape: bf16[32,256], index: 3, kind: input, shape index: {}]   ;;  %s1432_s4 = inlined_call_operand.hbm [shape: bf16[256,128], index: 4, kind: input, shape index: {}]   ;;  %s1433_s5 = inlined_call_operand.vmem [shape: f32[1,128], index: 5, kind: input, shape index: {}]   ;;  %s1434_s6 = inlined_call_operand.vmem [shape: f32[1,128], index: 6, kind: input, shape index: {}]   ;;  %s1435_s7 = inlined_call_operand.<no memory space> [shape: f32[1,1], index: 7, kind: input, shape index: {}]   ;;  %s1436_s8 = inlined_call_operand.hbm [shape: f32[2,1,16], index: 8, kind: output, shape index: {}]  }
   0x1   :  { %1437 = sst [smem:[#allocation13_spill]] %s1430_s2  ;;  %v13_v0 = vstv %s1435_s7 }
   0x2   :  { %1438 = sst [smem:[#allocation14_spill]] %s1431_s3  ;;  %14 = vst [vmem:[#allocation2] sm:$0x1] %v13_v0 }
   0x3   :  { %15 = vsyncpa [#allocation4], 0 }
   0x4   :  { %16 = vsyncpa [#allocation7], 0 }
   0x5   :  { %17 = vsyncpa [#allocation5], 0 }
   0x6   :  { %19 = vsyncpa [#allocation5 + $0x1], 0  ;;  %s1297_s29 = smov 0   ;;  %s1299_s30 = smov 0  }
   0x7   :  { %s1301_s9 = smov 0   ;;  %s1303_s10 = smov 0  }
   0x8 LB: > { %s1318_s7 = sadd.s32 4294967295, %s1239_s10   ;;  %s870_s11 = sadd.s32 4294967294, %s1239_s10   ;;  %s1239_s10 = sphi %s1303_s10, %s1448_s10   ;;  %s1235_s9 = sphi %s1301_s9, %s1447_s9   ;;  %s1231_s30 = sphi %s1299_s30, %s1446_s30   ;;  %s1227_s29 = sphi %s1297_s29, %s1445_s29  }
   0x9   : > { %s1322_s12 = sadd.s32 1, %s1239_s10   ;;  %s210_s13 = sadd.s32 1, %s1235_s9 }
   0xa   : > { %s207_s14 = ssub.s32 %s1239_s10, %s1322_s12  ;;  %p220_p0 = scmp.ne.s32.totalorder %s1235_s9, %s1231_s30 }
   0xb   : > { %p208_p1 = scmp.eq.s32.totalorder %s207_s14, 0  ;;  %p221_p2 = scmp.eq.s32.totalorder %s1318_s7, 1 }
   0xc   : > { %p226_p3 = scmp.ne.s32.totalorder %s1231_s30, %s1227_s29  ;;  %p227_p4 = scmp.eq.s32.totalorder %s870_s11, 1 }
   0xd   : > { %s1333_s15 = scalar_select %p208_p1, %s1235_s9, %s210_s13  }
   0xe   : > { %p1335_p5 = por %p221_p2, %p220_p0  ;;  %p1339_p6 = por %p227_p4, %p226_p3 }
   0xf   : > { %p871_p7 = scmp.ge.s32.totalorder %s1239_s10, 1  ;;  %p234_p8 = scmp.lt.s32.totalorder %s1239_s10, 3 }
  0x10   : > { %p1018_p9 = scmp.eq.s32.totalorder %s1318_s7, 0  ;;  %s1442_s3 = sld [smem:[#allocation14_spill]] }
  0x11   : > { %p1346_p10 = pnand %p871_p7, %p234_p8  ;;  %s1241_s22 = smov [#allocation6]  }
  0x12   : > { %s259_s23 = sshll.u32 %s1241_s22, 4  ;;  %s1444_s2 = sld [smem:[#allocation13_spill]]  ;;  %s260_s23 = int_to_ptr.vmem [resolvable:$true] %s259_s23 }
  0x13   : > { %p1004_p11 = pneg %p1346_p10  ;;  %s1242_s28 = smov 128  }
  0x14   : > { %s1243_s11 = smov 8   ;;  %s1244_s13 = smov [#allocation3]  }
  0x15   : > { %p1357_p12 = pnand %p1018_p9, %p1004_p11  ;;  %s248_s14 = sshll.u32 %s1244_s13, 4  ;;  %s249_s14 = int_to_ptr.vmem [resolvable:$true] %s248_s14 }
  0x16   : > { %s257_s21 = sshll.u32 %s1442_s3, 4  ;;  %s271_s22 = sshll.u32 %s1432_s4, 4  ;;  %s258_s21 = int_to_ptr.hbm [resolvable:$true] %s257_s21  ;;  %s272_s22 = int_to_ptr.hbm [resolvable:$true] %s271_s22 }
  0x17   : > { %1010 = dma.hbm_to_vmem [thread:$0]  (!%p1357_p12), %s258_s21, 512, %s260_s23, [#allocation7], %s1242_s28, %s1242_s28, %s1243_s11  }
  0x18   : > { %s246_s27 = sshll.u32 %s1444_s2, 4  ;;  %s1245_s25 = smov [#allocation8]   ;;  %s247_s27 = int_to_ptr.hbm [resolvable:$true] %s246_s27 }
  0x19   : > { %1007 = dma.hbm_to_vmem [thread:$0]  (!%p1357_p12), %s247_s27, 128, %s249_s14, [#allocation4]  }
  0x1a   : > { %s273_s26 = sshll.u32 %s1245_s25, 4  ;;  %s1246_s2 = smov 64   ;;  %s274_s26 = int_to_ptr.vmem [resolvable:$true] %s273_s26 }
  0x1b   : > { %s1247_s3 = smov 4   ;;  %316 = sbr.rel (%p1346_p10) target bundleno = 581 (0x245), region = 52 }
  0x1c   : > { %1013 = dma.hbm_to_vmem [thread:$0]  (!%p1357_p12), %s272_s22, 2048, %s274_s26, [#allocation7], %s1246_s2, %s1246_s2, %s1247_s3  }
  0x20   : > { %1214 = dma.done.wait (%p1018_p9), [#allocation4], 128  }
  0x21   : > { %1216 = vsyncadd (%p1018_p9), [#allocation4], 4294967168 }
  0x22   : > { %1218 = dma.done.wait (%p1018_p9), [#allocation7], 2560  }
  0x23   : > { %1220 = vsyncadd (%p1018_p9), [#allocation7], 4294964736  ;;  %s880_s21 = sshll.u32 %s1318_s7, 1  ;;  %v1248_v1 = vmov 0   ;;  %v894_v2 = vld [vmem:[#allocation6 + $0x10] sm:$0xf]  ;;  %s768_s26 = scalar_lea.hbm %s1436_s8, %s1318_s7 }
  0x24   : > { %1065 = vset.pattern.permute.xlu0 %v1248_v1  ;;  %1066 = vset.pattern.permute.xlu1 %v1248_v1  ;;  %p366_p13 = scmp.lt.s32.totalorder %s880_s21, 3  ;;  %v973_v3 = vld [vmem:[#allocation6 + $0x14] sm:$0xf0]  ;;  %v972_v4 = vld [vmem:[#allocation6 + $0x14] sm:$0xf]  ;;  %vm481_vm3 = vcmask 261120  }
  0x25   : > { %1067 = vset.pattern.permute.xlu2 %v1248_v1  ;;  %v895_v5 = vor.u32 %v973_v3, %v894_v2  ;;  %v896_v6 = vld [vmem:[#allocation6 + $0x18] sm:$0xf0]  ;;  %v886_v7 = vld [vmem:[#allocation6] sm:$0xf]  ;;  %v971_v8 = vld [vmem:[#allocation6 + $0x4] sm:$0xf0] }
  0x26   : > { %s1450_s21 = smov (!%p366_p13, %s880_s21), 3  ;;  %v899_v9 = vor.u32 %v972_v4, %v896_v6  ;;  %v970_v10 = vld [vmem:[#allocation6 + $0x4] sm:$0xf]  ;;  %v888_v11 = vld [vmem:[#allocation6 + $0x8] sm:$0xf0]  ;;  %v887_v13 = vor.u32 %v971_v8, %v886_v7  ;;  %v981_v20 = vld [vmem:[#allocation8 + $0x38] sm:$0xff] }
  0x27   : > { %s881_s2 = sshll.u32 %s1450_s21, 3  ;;  %491 = vmatpush.bf16.msra.mxu0 %v895_v5  ;;  %v891_v16 = vor.u32 %v970_v10, %v888_v11  ;;  %v989_v21 = vld [vmem:[#allocation8 + $0x78] sm:$0xff]  ;;  %655 = vmatpush.bf16.msra.mxu2 %v981_v20  ;;  %v980_v27 = vld [vmem:[#allocation8 + $0x30] sm:$0xff]  ;;  %v979_v29 = vld [vmem:[#allocation8 + $0x28] sm:$0xff]  ;;  %s363_s20 = sand.u32 1, %s1231_s30  }
  0x28   : > { %s375_s23 = scalar_lea.vmem %s1429_s1, %s881_s2  ;;  %s369_s28 = scalar_lea.vmem %s1428_s0, %s881_s2  ;;  %505 = vmatpush.bf16.msra.mxu1 %v899_v9  ;;  %669 = vmatpush.bf16.msra.mxu3 %v989_v21  ;;  %v988_v28 = vld [vmem:[#allocation8 + $0x70] sm:$0xff]  ;;  %v987_v30 = vld [vmem:[#allocation8 + $0x68] sm:$0xff]  ;;  %v978_v31 = vld [vmem:[#allocation8 + $0x20] sm:$0xff] }
  0x29   : > { %v385_v12 = vld [vmem:[%s375_s23] sm:$0xff]  ;;  %v379_v15 = vld [vmem:[%s369_s28 + $0x8] sm:$0xff]  ;;  %v975_v37 = vld [vmem:[#allocation8 + $0x8] sm:$0xff]  ;;  %s364_s21 = scalar_lea.vmem [#allocation9], %s363_s20  ;;  %s772_s3 = sshll.u32 %s768_s26, 4  ;;  %s773_s3 = int_to_ptr.hbm [resolvable:$true] %s772_s3 }
  0x2a   : > { %vm395_vm0 = vcmp.eq.s32.totalorder %v385_v12, 1  ;;  %vm417_vm1 = vcmp.eq.s32.totalorder %v385_v12, 2  ;;  %v378_v14 = vld [vmem:[%s369_s28] sm:$0xff]  ;;  %vm439_vm2 = vcmp.eq.s32.totalorder %v385_v12, 3  ;;  %v386_v19 = vld [vmem:[%s375_s23 + $0x8] sm:$0xff]  ;;  %v983_v38 = vld [vmem:[#allocation8 + $0x48] sm:$0xff] }
  0x2b   : > { %v397_v17 = vsel %vm395_vm0, 1, %v1248_v1  ;;  %v419_v18 = vsel %vm417_vm1, 1, %v1248_v1  ;;  %v441_v22 = vsel %vm439_vm2, 1, %v1248_v1  ;;  %v380_v23 = vpack.c.bf16 %v379_v15, %v378_v14  ;;  %492 = vmatpush.bf16.msra.mxu0 %v887_v13  ;;  %656 = vmatpush.bf16.msra.mxu2 %v980_v27  ;;  %v986_v32 = vld [vmem:[#allocation8 + $0x60] sm:$0xff]  ;;  %v977_v33 = vld [vmem:[#allocation8 + $0x18] sm:$0xff]  ;;  %v976_v35 = vld [vmem:[#allocation8 + $0x10] sm:$0xff] }
  0x2c   : > { %400 = vperm.xlu0 %1065, %v397_v17   ;;  %422 = vperm.xlu1 %1066, %v419_v18   ;;  %vm396_vm4 = vcmp.eq.s32.totalorder %v386_v19, 1  ;;  %vm418_vm5 = vcmp.eq.s32.totalorder %v386_v19, 2  ;;  %vm440_vm6 = vcmp.eq.s32.totalorder %v386_v19, 3  ;;  %v985_v34 = vld [vmem:[#allocation8 + $0x58] sm:$0xff]  ;;  %v984_v36 = vld [vmem:[#allocation8 + $0x50] sm:$0xff]  ;;  %v974_v39 = vld [vmem:[#allocation8] sm:$0xff] }
  0x2d   : > { %444 = vperm.xlu2 %1067, %v441_v22   ;;  %506 = vmatpush.bf16.msra.mxu1 %v891_v16  ;;  %v398_v24 = vsel %vm396_vm4, 1, %v1248_v1  ;;  %v420_v25 = vsel %vm418_vm5, 1, %v1248_v1  ;;  %v442_v26 = vsel %vm440_vm6, 1, %v1248_v1  ;;  %v982_v40 = vld [vmem:[#allocation8 + $0x40] sm:$0xff]  ;;  %v387_v41 = vld [vmem:[#allocation3] sm:$0xff]  ;;  %s770_s2 = sshll.u32 %s364_s21, 4  ;;  %s771_s2 = int_to_ptr.vmem [resolvable:$true] %s770_s2 }
  0x2e   : > { %900 = vmatmul.msk.bf16.vlgmr.msra.gmra.mxu0 %vm481_vm3, %v380_v23  ;;  %670 = vmatpush.bf16.msra.mxu3 %v988_v28  ;;  %v389_v43 = vperm.slane %v387_v41, 0  ;;  %v407_v44 = vperm.slane %v387_v41, 1  ;;  %v390_v45 = vperm.slane %v387_v41, 4  ;;  %v408_v46 = vperm.slane %v387_v41, 5  ;;  %s760_s18 = scalar_lea.sflag [#allocation5], %s363_s20  ;;  %s1183_s23 = sshra.s32 %s773_s3, 4  ;;  %s1184_s23 = int_to_ptr.hbm [resolvable:$true] %s1183_s23 }
  0x2f   : > { %657 = vmatpush.bf16.msra.mxu2 %v979_v29  ;;  %v429_v48 = vperm.slane %v387_v41, 2  ;;  %v430_v51 = vperm.slane %v387_v41, 6  ;;  %v451_v55 = vperm.slane %v387_v41, 3  ;;  %v452_v57 = vperm.slane %v387_v41, 7  ;;  %s1185_s24 = scalar_lea.hbm %s1184_s23, 1  ;;  %s1189_s28 = scalar_lea.hbm %s1436_s8, 2 }
  0x30   : > { %901 = vmatmul.msk.bf16.vlgmr.msra.gmra.mxu1 %vm481_vm3, %v380_v23  ;;  %v393_v49 = vperm.slane %v389_v43, 0  ;;  %v411_v50 = vperm.slane %v407_v44, 1  ;;  %v394_v53 = vperm.slane %v390_v45, 0  ;;  %v412_v54 = vperm.slane %v408_v46, 1  ;;  %v1070_v46 = vld [vmem:[#allocation2] ss:$0 sm:$0xff]  ;;  %p1186_p0 = scmp.ne.s32.totalorder %s1184_s23, %s1185_s24  ;;  %p1190_p3 = scmp.lt.s32.totalorder %s1184_s23, %s1436_s8 }
  0x31   : > { %v433_v56 = vperm.slane %v429_v48, 2  ;;  %v434_v59 = vperm.slane %v430_v51, 2  ;;  %v455_v62 = vperm.slane %v451_v55, 3  ;;  %v456_v1 = vperm.slane %v452_v57, 3  ;;  %p1191_p4 = scmp.lt.s32.totalorder %s1189_s28, %s1185_s24 }
  0x32   : > { %671 = vmatpush.bf16.msra.mxu3 %v987_v30  ;;  %v1068_v30 = vld [vmem:[%s1433_s5] ss:$0 sm:$0xff]  ;;  %vm754_vm5 = vcmask 130112   ;;  %vm757_vm6 = vcmask 122880   ;;  %p1187_p1 = pnand %p1186_p0, %p1335_p5 }
  0x33   : > { %658 = vmatpush.bf16.msra.mxu2 %v978_v31  ;;  %p1192_p7 = por %p1191_p4, %p1190_p3 }
  0x34   : > { %403 = vperm.xlu0 %1065, %v398_v24   ;;  %425 = vperm.xlu1 %1066, %v420_v25   ;;  %p1188_p2 = pneg %p1187_p1 }
  0x35   : > { %447 = vperm.xlu2 %1067, %v442_v26  }
  0x36   : > { %672 = vmatpush.bf16.msra.mxu3 %v986_v32  ;;  %p1193_p8 = pnand %p1192_p7, %p1188_p2 }
  0x37   : > { %659 = vmatpush.bf16.msra.mxu2 %v977_v33 }
  0x3a   : > { %673 = vmatpush.bf16.msra.mxu3 %v985_v34 }
  0x3b   : > { %660 = vmatpush.bf16.msra.mxu2 %v976_v35 }
  0x3e   : > { %674 = vmatpush.bf16.msra.mxu3 %v984_v36  ;;  %v1069_v36 = vld [vmem:[%s1434_s6] ss:$0 sm:$0xff] }
  0x3f   : > { %661 = vmatpush.bf16.msra.mxu2 %v975_v37 }
  0x42   : > { %675 = vmatpush.bf16.msra.mxu3 %v983_v38 }
  0x43   : > { %662 = vmatpush.bf16.msra.mxu2 %v974_v39 }
  0x46   : > { %676 = vmatpush.bf16.msra.mxu3 %v982_v40 }
  0x87   : > { %v445_v52 = vpop.permute.xlu2 %444 }
  0x88   : > { %vm449_vm9 = vcmp.eq.s32.totalorder %v445_v52, 1 }
  0x8f   : > { %v448_v6 = vpop.permute.xlu2 %447 }
  0x90   : > { %vm450_vm12 = vcmp.eq.s32.totalorder %v448_v6, 1 }
  0x9e   : > { %v401_v42 = vpop.permute.xlu0 %400  ;;  %v423_v47 = vpop.permute.xlu1 %422 }
  0x9f   : > { %vm405_vm7 = vcmp.eq.s32.totalorder %v401_v42, 1  ;;  %vm427_vm8 = vcmp.eq.s32.totalorder %v423_v47, 1 }
  0xa0   : > { %v413_v58 = vsel %vm405_vm7, %v411_v50, %v393_v49  ;;  %v414_v61 = vsel %vm405_vm7, %v412_v54, %v394_v53 }
  0xa1   : > { %v435_v63 = vsel %vm427_vm8, %v433_v56, %v413_v58  ;;  %v436_v2 = vsel %vm427_vm8, %v434_v59, %v414_v61 }
  0xa2   : > { %v457_v7 = vsel %vm449_vm9, %v455_v62, %v435_v63  ;;  %v458_v9 = vsel %vm449_vm9, %v456_v1, %v436_v2 }
  0xa6   : > { %v404_v60 = vpop.permute.xlu0 %403  ;;  %v426_v0 = vpop.permute.xlu1 %425 }
  0xa7   : > { %vm406_vm10 = vcmp.eq.s32.totalorder %v404_v60, 1  ;;  %vm428_vm11 = vcmp.eq.s32.totalorder %v426_v0, 1 }
  0xa8   : > { %v415_v5 = vsel %vm406_vm10, %v411_v50, %v393_v49  ;;  %v416_v8 = vsel %vm406_vm10, %v412_v54, %v394_v53 }
  0xa9   : > { %v437_v10 = vsel %vm428_vm11, %v433_v56, %v415_v5  ;;  %v438_v12 = vsel %vm428_vm11, %v434_v59, %v416_v8 }
  0xaa   : > { %v459_v14 = vsel %vm450_vm12, %v455_v62, %v437_v10  ;;  %v460_v18 = vsel %vm450_vm12, %v456_v1, %v438_v12 }
  0xab   : > { %v494_v3 = vpop.f32.mrf.mxu0 }
  0xac   : > { %v495_v11 = vadd.f32 %v494_v3, %v457_v7 }
  0xad   : > { %v508_v4 = vpop.f32.mrf.mxu1 }
  0xae   : > { %v509_v13 = vadd.f32 %v508_v4, %v458_v9  ;;  %v513_v16 = vmul.f32 0.2, %v495_v11 }
  0xb0   : > { %v514_v20 = vmul.f32 0.2, %v509_v13  ;;  %v517_v24 = vmax.f32 %v495_v11, %v513_v16 }
  0xb2   : > { %v518_v26 = vmax.f32 %v509_v13, %v514_v20  ;;  %v749_v13 = vlaneseq }
  0xb3   : > { %v496_v15 = vpop.f32.mrf.mxu0 }
  0xb4   : > { %v497_v17 = vadd.f32 %v496_v15, %v459_v14  ;;  %v750_v15 = vand.u32 127, %v749_v13 }
  0xb5   : > { %v510_v19 = vpop.f32.mrf.mxu1 }
  0xb6   : > { %v511_v21 = vadd.f32 %v510_v19, %v460_v18  ;;  %v515_v22 = vmul.f32 0.2, %v497_v17  ;;  %v752_v16 = vadd.s32 4294967288, %v750_v15 }
  0xb8   : > { %v516_v23 = vmul.f32 0.2, %v511_v21  ;;  %v519_v25 = vmax.f32 %v497_v17, %v515_v22 }
  0xba   : > { %v520_v27 = vmax.f32 %v511_v21, %v516_v23  ;;  %v521_v28 = vpack.c.bf16 %v519_v25, %v517_v24 }
  0xbc   : > { %v522_v29 = vpack.c.bf16 %v520_v27, %v518_v26  ;;  %663 = vmatmul.bf16.vlgmr.msra.gmra.mxu2 %v521_v28 }
  0xbe   : > { %677 = vmatmul.bf16.vlgmr.msra.gmra.mxu3 %v522_v29 }
 0x13f   : > { %v664_v31 = vpop.f32.mrf.mxu2 }
 0x140   : > { %v665_v32 = vadd.f32 %v1068_v30, %v664_v31 }
 0x141   : > { %v678_v33 = vpop.f32.mrf.mxu3 }
 0x142   : > { %v679_v34 = vadd.f32 %v678_v33, %v665_v32 }
 0x144   : > { %v683_v35 = vmul.f32 0.2, %v679_v34 }
 0x146   : > { %v685_v37 = vmax.f32 %v679_v34, %v683_v35 }
 0x147   : > { %v666_v38 = vpop.f32.mrf.mxu2 }
 0x148   : > { %v667_v39 = vadd.f32 %v1068_v30, %v666_v38  ;;  %v691_v40 = vmul.f32 %v1069_v36, %v685_v37 }
 0x149   : > { %v680_v41 = vpop.f32.mrf.mxu3 }
 0x14a   : > { %v681_v42 = vadd.f32 %v680_v41, %v667_v39  ;;  %693 = vadd.xlane.f32.xlu0 %v691_v40 }
 0x14c   : > { %v684_v43 = vmul.f32 0.2, %v681_v42 }
 0x14e   : > { %v686_v44 = vmax.f32 %v681_v42, %v684_v43 }
 0x150   : > { %v692_v45 = vmul.f32 %v1069_v36, %v686_v44 }
 0x152   : > { %695 = vadd.xlane.f32.xlu1 %v692_v45 }
 0x1bd   : > { %v694_v47 = vpop.xlane.xlu0 %693 }
 0x1be   : > { %v701_v48 = vadd.f32 %v1070_v46, %v694_v47 }
 0x1c0   : > { %v966_v49 = vmul.f32 -1.442695, %v701_v48 }
 0x1c2   : > { %1071 = vpow2.f32 %v966_v49 }
 0x1c5   : > { %v696_v50 = vpop.xlane.xlu1 %695 }
 0x1c6   : > { %v702_v51 = vadd.f32 %v1070_v46, %v696_v50 }
 0x1c8   : > { %v1072_v52 = vpop.eup %1071  ;;  %v967_v53 = vmul.f32 -1.442695, %v702_v51 }
 0x1c9   : > { %v709_v54 = vadd.f32 1.0, %v1072_v52 }
 0x1ca   : > { %1073 = vpow2.f32 %v967_v53 }
 0x1cb   : > { %1075 = vrcp.f32 %v709_v54  ;;  %v722_v60 = vand.u32 2147483648, %v709_v54  ;;  %v720_v62 = vand.u32 2147483647, %v709_v54  ;;  %vm716_vm14 = vweird.f32 %v709_v54 }
 0x1cd   : > { %v723_v1 = vor.u32 1.1754944e-38, %v722_v60  ;;  %vm721_vm0 = vcmp.eq.f32.partialorder %v720_v62, 8.507059e+37 }
 0x1d0   : > { %v1074_v55 = vpop.eup %1073 }
 0x1d1   : > { %v1076_v56 = vpop.eup %1075  ;;  %v710_v57 = vadd.f32 1.0, %v1074_v55 }
 0x1d2   : > { %v712_v58 = vmul.f32 %v1076_v56, %v709_v54  ;;  %vm717_vm13 = vweird.f32 %v1076_v56 }
 0x1d3   : > { %1077 = vrcp.f32 %v710_v57  ;;  %vm718_vm15 = vmor %vm716_vm14, %vm717_vm13  ;;  %v737_v6 = vand.u32 2147483648, %v710_v57  ;;  %v735_v8 = vand.u32 2147483647, %v710_v57  ;;  %vm731_vm2 = vweird.f32 %v710_v57 }
 0x1d4   : > { %v713_v59 = vsub.f32 1.0, %v712_v58 }
 0x1d5   : > { %v738_v10 = vor.u32 1.1754944e-38, %v737_v6  ;;  %vm736_vm4 = vcmp.eq.f32.partialorder %v735_v8, 8.507059e+37 }
 0x1d6   : > { %v714_v61 = vmul.f32 %v1076_v56, %v713_v59 }
 0x1d8   : > { %v715_v63 = vadd.f32 %v1076_v56, %v714_v61 }
 0x1d9   : > { %v1078_v0 = vpop.eup %1077 }
 0x1da   : > { %v719_v2 = vsel %vm718_vm15, %v1076_v56, %v715_v63  ;;  %v727_v3 = vmul.f32 %v1078_v0, %v710_v57  ;;  %vm732_vm1 = vweird.f32 %v1078_v0 }
 0x1db   : > { %v724_v4 = vsel %vm721_vm0, %v723_v1, %v719_v2  ;;  %vm733_vm3 = vmor %vm731_vm2, %vm732_vm1 }
 0x1dc   : > { %744 = vperm.xlu2 %1067, %v724_v4   ;;  %v728_v5 = vsub.f32 1.0, %v727_v3 }
 0x1de   : > { %v729_v7 = vmul.f32 %v1078_v0, %v728_v5 }
 0x1e0   : > { %v730_v9 = vadd.f32 %v1078_v0, %v729_v7 }
 0x1e2   : > { %v734_v11 = vsel %vm733_vm3, %v1078_v0, %v730_v9 }
 0x1e3   : > { %v739_v12 = vsel %vm736_vm4, %v738_v10, %v734_v11 }
 0x1e4   : > { %747 = vperm.xlu2 %1067, %v739_v12  }
 0x236   : > { %v745_v14 = vpop.permute.xlu2 %744 }
 0x237   : > { %v751_v18 = vperm.slane %v745_v14, %v750_v15 }
 0x23e   : > { %v748_v17 = vpop.permute.xlu2 %747 }
 0x23f   : > { %v753_v19 = vperm.slane %v748_v17, %v752_v16 }
 0x241   : > { %v755_v20 = vsel %vm754_vm5, %v753_v19, %v751_v18 }
 0x242   : > { %758 = vst.msk [vmem:[%s364_s21] sm:$0x1] %vm757_vm6, %v755_v20 }
 0x243   : > { %1196 = shalt.err (!%p1193_p8)
}
 0x244   : > { %1002 = dma.vmem_to_hbm [thread:$0]  (%p1335_p5), %s771_s2, 16, %s773_s3, %s760_s18  }
 0x245 PF: > { %p1024_p9 = scmp.ge.s32.totalorder %s1239_s10, 2  ;;  %s784_s14 = sand.u32 1, %s1227_s29  }
 0x246   : > { %s785_s19 = scalar_lea.sflag [#allocation5], %s784_s14 }
 0x247   : > { %p1015_p10 = pnand %p1024_p9, %p1339_p6 }
 0x249   : > { %p1016_p11 = pneg %p1015_p10 }
 0x24b   : > { %1222 = dma.done.wait (%p1016_p11), %s785_s19, 16  }
 0x24c   : > { %1224 = vsyncadd (%p1016_p11), %s785_s19, 4294967280  ;;  %p22_p12 = scmp.ge.s32.totalorder %s1322_s12, 4   ;;  %s1445_s29 = smov %s1231_s30 }
 0x24d   : > { %s1446_s30 = smov %s1235_s9  ;;  %s1447_s9 = smov %s1333_s15 }
 0x24e   : > { %s1448_s10 = smov %s1322_s12  ;;  %24 = sbr.rel (!%p22_p12) target bundleno = 8 (0x8), region = 103 }
 0x253   :  { %790 = vsyncpa [#allocation4], 1 }
 0x254   :  { %792 = vsyncpa [#allocation4 + $0x1], 1 }
 0x255   :  { %793 = vsyncpa [#allocation7], 1 }
 0x256   :  { %794 = vsyncpa [#allocation5], 1 }
 0x257   :  { %796 = vsyncpa [#allocation5 + $0x1], 1 }

</bundles_post_ra>
